<compile_context>
chip_gen: v7x
topology: tpu7x:2x2x1
jax: 0.10.0
libtpu: 0.0.40
codegen_flags: <defaults>
</compile_context>

<pallas_src>
import numpy as np

import jax
import jax.numpy as jnp
from jax import lax
from jax.experimental import pallas as pl
from jax.experimental.pallas import tpu as pltpu

LEAKY_SLOPE = 0.01                       # nn.LeakyReLU default
BN_EPS = 1e-5                            # nn.BatchNorm1d default
LAYER_CFG = ((9, 4), (7, 3), (5, 2))     # (kernel_size, stride) for conv1..conv3
C1, C2, C3 = 8, 4, 2                     # output channels of conv1..conv3
K1, S1 = LAYER_CFG[0]
K2, S2 = LAYER_CFG[1]
K3, S3 = LAYER_CFG[2]

# Lane offsets of each parameter block inside the single packed (8, 128) buffer.
_W1_OFF = 0                      # (8, K1)      grouped conv1 weight
_P1_OFF = _W1_OFF + K1           # (8, 3)       [bias, gamma, beta] layer 1
_P2_OFF = _P1_OFF + 3            # (4, 3)       layer 2
_P3_OFF = _P2_OFF + 3            # (2, 3)       layer 3
_W2_OFF = _P3_OFF + 3            # (4, K2*C1)   conv2 weight, flattened (co, k*C1+ci)
_W3_OFF = _W2_OFF + K2 * C1      # (2, K3*C2)   conv3 weight, flattened (co, k*C2+ci)
_PRM_COLS = 128                  # one (8, 128) lane tile


def _out_len(L, K, s):
    return (L - K) // s + 1


# --------------------------- in-kernel helper (traced) --------------------------
def _bias_leaky_bn(y, p):
    """bias + LeakyReLU + BatchNorm1d (batch statistics) on a (C, N*Lo) tile.

    p packs per-channel [bias, gamma, beta] as (C, 3).  All N*Lo positions are
    lane-resident, so the stats are plain lane reductions; two-pass mean/var
    (matches PyTorch numerics better than E[x^2]-E[x]^2), folded into one FMA.
    """
    y = y + p[:, 0:1]                                   # conv bias
    y = jnp.where(y >= 0, y, LEAKY_SLOPE * y)           # LeakyReLU(0.01)
    inv_m = 1.0 / float(y.shape[1])                     # 1 / (N * L_out)
    mean = jnp.sum(y, axis=1, keepdims=True) * inv_m
    d = y - mean
    var = jnp.sum(d * d, axis=1, keepdims=True) * inv_m  # biased var, f32
    return d * (p[:, 1:2] * lax.rsqrt(var + BN_EPS)) + p[:, 2:3]


# ----------------------------------- kernel ------------------------------------
def _encoder_kernel(xg_ref, prm_ref, pk1_ref, pk2_ref, pk3_ref, o_ref):
    xg = xg_ref[...]                     # (8, N*L)  lane-dense, per-group replicated
    prm = prm_ref[...]                   # (8, 128)  packed params (one DMA)
    pk1 = pk1_ref[...]                   # (P1, N*Lo1) 0/1 strided-pick (static, hoisted)
    pk2 = pk2_ref[...]                   # (P2, N*Lo2)
    pk3 = pk3_ref[...]                   # (P3, N*Lo3)

    w1 = prm[:, _W1_OFF:_W1_OFF + K1]                    # (8, 9)
    p1 = prm[:, _P1_OFF:_P1_OFF + 3]                     # (8, 3)
    p2 = prm[0:C2, _P2_OFF:_P2_OFF + 3]                  # (4, 3)
    p3 = prm[0:C3, _P3_OFF:_P3_OFF + 3]                  # (2, 3)
    w2f = prm[0:C2, _W2_OFF:_W2_OFF + K2 * C1]           # (4, 56)
    w3f = prm[0:C3, _W3_OFF:_W3_OFF + K3 * C2]           # (2, 20)

    # ---- layer 1: grouped Conv1d(Cin -> 8, K=9, s=4, groups=Cin) ----
    # K1 VPU FMAs on the replicated input (stride-1 full conv), then one small
    # MXU matmul with the 0/1 pick matrix to realize the stride.
    P1 = pk1.shape[0]
    z1 = w1[:, 0:1] * xg[:, 0:P1]
    for k in range(1, K1):
        z1 = z1 + w1[:, k:k + 1] * xg[:, k:k + P1]       # (8,1) * (8,P1)
    h1 = _bias_leaky_bn(
        jnp.dot(z1, pk1, preferred_element_type=jnp.float32), p1)   # (8, N*Lo1)

    # ---- layer 2: Conv1d(8 -> 4, K=7, s=3) as ONE fused MXU matmul + pick ----
    P2 = pk2.shape[0]
    m2 = jnp.concatenate([h1[:, k:k + P2] for k in range(K2)], axis=0)   # (56, P2)
    z2 = jnp.dot(w2f, m2, preferred_element_type=jnp.float32)           # (4, P2)
    h2 = _bias_leaky_bn(
        jnp.dot(z2, pk2, preferred_element_type=jnp.float32), p2)       # (4, N*Lo2)

    # ---- layer 3: Conv1d(4 -> 2, K=5, s=2) ----
    P3 = pk3.shape[0]
    m3 = jnp.concatenate([h2[:, k:k + P3] for k in range(K3)], axis=0)   # (20, P3)
    z3 = jnp.dot(w3f, m3, preferred_element_type=jnp.float32)           # (2, P3)
    h3 = _bias_leaky_bn(
        jnp.dot(z3, pk3, preferred_element_type=jnp.float32), p3)       # (2, N*Lo3)

    # Single lane-dense unmasked store; NCL reshape happens in the wrapper.
    o_ref[...] = h3


# ---------------------------------- wrapper -------------------------------------
def _pick_matrix_np(N, Lin, K, stride):
    """(P, N*Lo) f32 0/1 matrix; column n*Lo+lo selects row n*Lin + lo*stride.

    Static (shape-only), built once at trace time in numpy and passed to the
    kernel as a VMEM constant, so no iota/compare/select work on the critical
    path.  Only non-batch-boundary-crossing windows are ever selected.
    """
    Lo = _out_len(Lin, K, stride)
    P = N * Lin - K + 1
    m = np.zeros((P, N * Lo), np.float32)
    for n in range(N):
        for lo in range(Lo):
            m[n * Lin + lo * stride, n * Lo + lo] = 1.0
    return m


def encoder_forward(x, params, in_channels):
    """x: (N, in_channels, L) float32 -> (N, 2, Lo3) float32 (PyTorch NCL)."""
    N, Cin, L = x.shape
    assert Cin == in_channels
    assert C1 % Cin == 0, "groups=in_channels requires in_channels | 8"
    per_group = C1 // Cin

    Lo1 = _out_len(L, K1, S1)
    Lo2 = _out_len(Lo1, K2, S2)
    Lo3 = _out_len(Lo2, K3, S3)
    assert Lo3 >= 1, "input length too short for the three conv layers"

    # ---- lane-dense input layout, done in XLA outside the kernel ----
    # xf[ci, n*L + t] = x[n, ci, t]; xg replicates each input channel per_group
    # times so sublane co of the grouped conv sees its own group's channel.
    xf = jnp.transpose(x, (1, 0, 2)).reshape(Cin, N * L)        # (Cin, N*L)
    xg = jnp.repeat(xf, per_group, axis=0)                      # (8, N*L)

    # ---- pack all six small param arrays into ONE (8, 128) buffer ----
    w1p = params["w1"][:, 0, :]                                              # (8, 9)
    w2f = jnp.transpose(params["w2"], (0, 2, 1)).reshape(C2, K2 * C1)        # (4, 56)
    w3f = jnp.transpose(params["w3"], (0, 2, 1)).reshape(C3, K3 * C2)        # (2, 20)
    p1 = jnp.stack([params["b1"], params["g1"], params["be1"]], axis=1)      # (8, 3)
    p2 = jnp.stack([params["b2"], params["g2"], params["be2"]], axis=1)      # (4, 3)
    p3 = jnp.stack([params["b3"], params["g3"], params["be3"]], axis=1)      # (2, 3)

    def pad8(a):
        return jnp.pad(a, ((0, 8 - a.shape[0]), (0, 0)))

    prm = jnp.concatenate(
        [w1p, p1, pad8(p2), pad8(p3), pad8(w2f), pad8(w3f)], axis=1)         # (8, 94)
    prm = jnp.pad(prm, ((0, 0), (0, _PRM_COLS - prm.shape[1])))              # (8, 128)

    # ---- static strided-pick matrices (trace-time numpy constants) ----
    pk1 = jnp.asarray(_pick_matrix_np(N, L, K1, S1))
    pk2 = jnp.asarray(_pick_matrix_np(N, Lo1, K2, S2))
    pk3 = jnp.asarray(_pick_matrix_np(N, Lo2, K3, S3))

    vmem = pl.BlockSpec(memory_space=pltpu.MemorySpace.VMEM)
    out = pl.pallas_call(
        _encoder_kernel,
        in_specs=[vmem] * 5,
        out_specs=vmem,
        out_shape=jax.ShapeDtypeStruct((C3, N * Lo3), jnp.float32),
    )(xg, prm, pk1, pk2, pk3)

    # (C3, N*Lo3) lane-dense slab -> PyTorch NCL (N, C3, Lo3), free in XLA.
    return jnp.transpose(out.reshape(C3, N, Lo3), (1, 0, 2))


# ------------------------------- params & reference ----------------------------
def init_params(key, in_channels):
    assert 8 % in_channels == 0, "groups=in_channels requires in_channels | 8"
    ks = jax.random.split(key, 6)

    def uinit(k, shape, fan_in):
        bound = 1.0 / (fan_in ** 0.5)
        return jax.random.uniform(k, shape, jnp.float32, -bound, bound)

    return {
        # conv1: Conv1d(Cin -> 8, K=9, stride=4, groups=Cin), weight (8, 1, 9)
        "w1": uinit(ks[0], (8, 1, 9), 1 * 9),
        "b1": uinit(ks[1], (8,), 1 * 9),
        "g1": jnp.ones((8,), jnp.float32),
        "be1": jnp.zeros((8,), jnp.float32),
        # conv2: Conv1d(8 -> 4, K=7, stride=3)
        "w2": uinit(ks[2], (4, 8, 7), 8 * 7),
        "b2": uinit(ks[3], (4,), 8 * 7),
        "g2": jnp.ones((4,), jnp.float32),
        "be2": jnp.zeros((4,), jnp.float32),
        # conv3: Conv1d(4 -> 2, K=5, stride=2)
        "w3": uinit(ks[4], (2, 4, 5), 4 * 5),
        "b3": uinit(ks[5], (2,), 4 * 5),
        "g3": jnp.ones((2,), jnp.float32),
        "be3": jnp.zeros((2,), jnp.float32),
    }


def _reference_forward(x, params, in_channels):
    """Pure-XLA reference (lax.conv_general_dilated) for a correctness check."""
    def conv(y, w, b, stride, groups=1):
        out = lax.conv_general_dilated(
            y, w, window_strides=(stride,), padding="VALID",
            dimension_numbers=("NCH", "OIH", "NCH"),
            feature_group_count=groups)
        return out + b[None, :, None]

    def act_bn(y, g, be):
        y = jnp.where(y >= 0, y, LEAKY_SLOPE * y)
        mean = jnp.mean(y, axis=(0, 2), keepdims=True)
        var = jnp.mean(jnp.square(y - mean), axis=(0, 2), keepdims=True)
        return (y - mean) * lax.rsqrt(var + BN_EPS) * g[None, :, None] + be[None, :, None]

    y = act_bn(conv(x, params["w1"], params["b1"], S1, in_channels),
               params["g1"], params["be1"])
    y = act_bn(conv(y, params["w2"], params["b2"], S2), params["g2"], params["be2"])
    y = act_bn(conv(y, params["w3"], params["b3"], S3), params["g3"], params["be3"])
    return y


if __name__ == "__main__":
    in_channels = 4
    N, L = 2, 128            # L=128 -> Lo1=30 -> Lo2=8 -> Lo3=2

    key = jax.random.PRNGKey(0)
    k_x, k_p = jax.random.split(key)
    x = jax.random.normal(k_x, (N, in_channels, L), dtype=jnp.float32)
    params = init_params(k_p, in_channels)

    fwd = jax.jit(encoder_forward, static_argnums=2)
    out = jax.block_until_ready(fwd(x, params, in_channels))
    assert out.shape == (N, 2, 2), out.shape

    # Sanity check against a pure-XLA reference (loose tolerance to accommodate
    # MXU / conv rounding differences across TPU generations).
    ref = jax.block_until_ready(_reference_forward(x, params, in_channels))
    assert jnp.allclose(out, ref, atol=5e-2, rtol=5e-2), \
        float(jnp.max(jnp.abs(out - ref)))

    print("KERNEL_OK")
</pallas_src>

<mosaic_0001>
module attributes {stable_mosaic.version = 11 : i64} {
  func.func @_encoder_kernel(%arg0: memref<8x256xf32, #tpu.memory_space<vmem>>, %arg1: memref<8x128xf32, #tpu.memory_space<vmem>>, %arg2: memref<248x60xf32, #tpu.memory_space<vmem>>, %arg3: memref<54x16xf32, #tpu.memory_space<vmem>>, %arg4: memref<12x4xf32, #tpu.memory_space<vmem>>, %arg5: memref<2x4xf32, #tpu.memory_space<vmem>>) attributes {dimension_semantics = [], scalar_prefetch = 0 : i64, scratch_operands = 0 : i64, tpu.core_type = #tpu.core_type<tc>} {
    %c0 = arith.constant 0 : index
    %c0_0 = arith.constant 0 : index
    %0 = vector.load %arg0[%c0, %c0_0] : memref<8x256xf32, #tpu.memory_space<vmem>>, vector<8x256xf32>
    %c0_1 = arith.constant 0 : index
    %c0_2 = arith.constant 0 : index
    %1 = vector.load %arg1[%c0_1, %c0_2] : memref<8x128xf32, #tpu.memory_space<vmem>>, vector<8x128xf32>
    %c0_3 = arith.constant 0 : index
    %c0_4 = arith.constant 0 : index
    %2 = vector.load %arg2[%c0_3, %c0_4] : memref<248x60xf32, #tpu.memory_space<vmem>>, vector<248x60xf32>
    %c0_5 = arith.constant 0 : index
    %c0_6 = arith.constant 0 : index
    %3 = vector.load %arg3[%c0_5, %c0_6] : memref<54x16xf32, #tpu.memory_space<vmem>>, vector<54x16xf32>
    %c0_7 = arith.constant 0 : index
    %c0_8 = arith.constant 0 : index
    %4 = vector.load %arg4[%c0_7, %c0_8] : memref<12x4xf32, #tpu.memory_space<vmem>>, vector<12x4xf32>
    %5 = vector.extract_strided_slice %1 {offsets = [0, 0], sizes = [8, 9], strides = [1, 1]} : vector<8x128xf32> to vector<8x9xf32>
    %6 = vector.extract_strided_slice %1 {offsets = [0, 9], sizes = [8, 3], strides = [1, 1]} : vector<8x128xf32> to vector<8x3xf32>
    %7 = vector.extract_strided_slice %1 {offsets = [0, 12], sizes = [4, 3], strides = [1, 1]} : vector<8x128xf32> to vector<4x3xf32>
    %8 = vector.extract_strided_slice %1 {offsets = [0, 15], sizes = [2, 3], strides = [1, 1]} : vector<8x128xf32> to vector<2x3xf32>
    %9 = vector.extract_strided_slice %1 {offsets = [0, 18], sizes = [4, 56], strides = [1, 1]} : vector<8x128xf32> to vector<4x56xf32>
    %10 = vector.extract_strided_slice %1 {offsets = [0, 74], sizes = [2, 20], strides = [1, 1]} : vector<8x128xf32> to vector<2x20xf32>
    %11 = vector.extract_strided_slice %5 {offsets = [0, 0], sizes = [8, 1], strides = [1, 1]} : vector<8x9xf32> to vector<8x1xf32>
    %12 = vector.extract_strided_slice %0 {offsets = [0, 0], sizes = [8, 248], strides = [1, 1]} : vector<8x256xf32> to vector<8x248xf32>
    %13 = vector.broadcast %11 : vector<8x1xf32> to vector<8x248xf32>
    %14 = arith.mulf %13, %12 : vector<8x248xf32>
    %15 = vector.extract_strided_slice %5 {offsets = [0, 1], sizes = [8, 1], strides = [1, 1]} : vector<8x9xf32> to vector<8x1xf32>
    %16 = vector.extract_strided_slice %0 {offsets = [0, 1], sizes = [8, 248], strides = [1, 1]} : vector<8x256xf32> to vector<8x248xf32>
    %17 = vector.broadcast %15 : vector<8x1xf32> to vector<8x248xf32>
    %18 = arith.mulf %17, %16 : vector<8x248xf32>
    %19 = arith.addf %14, %18 : vector<8x248xf32>
    %20 = vector.extract_strided_slice %5 {offsets = [0, 2], sizes = [8, 1], strides = [1, 1]} : vector<8x9xf32> to vector<8x1xf32>
    %21 = vector.extract_strided_slice %0 {offsets = [0, 2], sizes = [8, 248], strides = [1, 1]} : vector<8x256xf32> to vector<8x248xf32>
    %22 = vector.broadcast %20 : vector<8x1xf32> to vector<8x248xf32>
    %23 = arith.mulf %22, %21 : vector<8x248xf32>
    %24 = arith.addf %19, %23 : vector<8x248xf32>
    %25 = vector.extract_strided_slice %5 {offsets = [0, 3], sizes = [8, 1], strides = [1, 1]} : vector<8x9xf32> to vector<8x1xf32>
    %26 = vector.extract_strided_slice %0 {offsets = [0, 3], sizes = [8, 248], strides = [1, 1]} : vector<8x256xf32> to vector<8x248xf32>
    %27 = vector.broadcast %25 : vector<8x1xf32> to vector<8x248xf32>
    %28 = arith.mulf %27, %26 : vector<8x248xf32>
    %29 = arith.addf %24, %28 : vector<8x248xf32>
    %30 = vector.extract_strided_slice %5 {offsets = [0, 4], sizes = [8, 1], strides = [1, 1]} : vector<8x9xf32> to vector<8x1xf32>
    %31 = vector.extract_strided_slice %0 {offsets = [0, 4], sizes = [8, 248], strides = [1, 1]} : vector<8x256xf32> to vector<8x248xf32>
    %32 = vector.broadcast %30 : vector<8x1xf32> to vector<8x248xf32>
    %33 = arith.mulf %32, %31 : vector<8x248xf32>
    %34 = arith.addf %29, %33 : vector<8x248xf32>
    %35 = vector.extract_strided_slice %5 {offsets = [0, 5], sizes = [8, 1], strides = [1, 1]} : vector<8x9xf32> to vector<8x1xf32>
    %36 = vector.extract_strided_slice %0 {offsets = [0, 5], sizes = [8, 248], strides = [1, 1]} : vector<8x256xf32> to vector<8x248xf32>
    %37 = vector.broadcast %35 : vector<8x1xf32> to vector<8x248xf32>
    %38 = arith.mulf %37, %36 : vector<8x248xf32>
    %39 = arith.addf %34, %38 : vector<8x248xf32>
    %40 = vector.extract_strided_slice %5 {offsets = [0, 6], sizes = [8, 1], strides = [1, 1]} : vector<8x9xf32> to vector<8x1xf32>
    %41 = vector.extract_strided_slice %0 {offsets = [0, 6], sizes = [8, 248], strides = [1, 1]} : vector<8x256xf32> to vector<8x248xf32>
    %42 = vector.broadcast %40 : vector<8x1xf32> to vector<8x248xf32>
    %43 = arith.mulf %42, %41 : vector<8x248xf32>
    %44 = arith.addf %39, %43 : vector<8x248xf32>
    %45 = vector.extract_strided_slice %5 {offsets = [0, 7], sizes = [8, 1], strides = [1, 1]} : vector<8x9xf32> to vector<8x1xf32>
    %46 = vector.extract_strided_slice %0 {offsets = [0, 7], sizes = [8, 248], strides = [1, 1]} : vector<8x256xf32> to vector<8x248xf32>
    %47 = vector.broadcast %45 : vector<8x1xf32> to vector<8x248xf32>
    %48 = arith.mulf %47, %46 : vector<8x248xf32>
    %49 = arith.addf %44, %48 : vector<8x248xf32>
    %50 = vector.extract_strided_slice %5 {offsets = [0, 8], sizes = [8, 1], strides = [1, 1]} : vector<8x9xf32> to vector<8x1xf32>
    %51 = vector.extract_strided_slice %0 {offsets = [0, 8], sizes = [8, 248], strides = [1, 1]} : vector<8x256xf32> to vector<8x248xf32>
    %52 = vector.broadcast %50 : vector<8x1xf32> to vector<8x248xf32>
    %53 = arith.mulf %52, %51 : vector<8x248xf32>
    %54 = arith.addf %49, %53 : vector<8x248xf32>
    %cst = arith.constant dense<0.000000e+00> : vector<8x60xf32>
    %55 = tpu.matmul %54, %2, %cst {dimension_numbers = #tpu.dot_dimension_numbers<[1], [0], [0], [1], [0, 0, 1, 1], [], []>} : vector<8x248xf32>, vector<248x60xf32>, vector<8x60xf32> -> vector<8x60xf32>
    %56 = vector.extract_strided_slice %6 {offsets = [0, 0], sizes = [8, 1], strides = [1, 1]} : vector<8x3xf32> to vector<8x1xf32>
    %57 = vector.broadcast %56 : vector<8x1xf32> to vector<8x60xf32>
    %58 = arith.addf %55, %57 : vector<8x60xf32>
    %cst_9 = arith.constant 0.000000e+00 : f32
    %59 = vector.broadcast %cst_9 : f32 to vector<8x60xf32>
    %60 = arith.cmpf oge, %58, %59 : vector<8x60xf32>
    %cst_10 = arith.constant 0.00999999977 : f32
    %61 = vector.broadcast %cst_10 : f32 to vector<8x60xf32>
    %62 = arith.mulf %61, %58 : vector<8x60xf32>
    %63 = arith.select %60, %58, %62 : vector<8x60xi1>, vector<8x60xf32>
    %cst_11 = arith.constant dense<0.000000e+00> : vector<8xf32>
    %64 = vector.multi_reduction <add>, %63, %cst_11 [1] : vector<8x60xf32> to vector<8xf32>
    %65 = vector.shape_cast %64 : vector<8xf32> to vector<8x1xf32>
    %cst_12 = arith.constant 0.0166666675 : f32
    %66 = vector.broadcast %cst_12 : f32 to vector<8x1xf32>
    %67 = arith.mulf %65, %66 : vector<8x1xf32>
    %68 = vector.broadcast %67 : vector<8x1xf32> to vector<8x60xf32>
    %69 = arith.subf %63, %68 : vector<8x60xf32>
    %70 = arith.mulf %69, %69 : vector<8x60xf32>
    %cst_13 = arith.constant dense<0.000000e+00> : vector<8xf32>
    %71 = vector.multi_reduction <add>, %70, %cst_13 [1] : vector<8x60xf32> to vector<8xf32>
    %72 = vector.shape_cast %71 : vector<8xf32> to vector<8x1xf32>
    %cst_14 = arith.constant 0.0166666675 : f32
    %73 = vector.broadcast %cst_14 : f32 to vector<8x1xf32>
    %74 = arith.mulf %72, %73 : vector<8x1xf32>
    %75 = vector.extract_strided_slice %6 {offsets = [0, 1], sizes = [8, 1], strides = [1, 1]} : vector<8x3xf32> to vector<8x1xf32>
    %cst_15 = arith.constant 9.99999974E-6 : f32
    %76 = vector.broadcast %cst_15 : f32 to vector<8x1xf32>
    %77 = arith.addf %74, %76 : vector<8x1xf32>
    %78 = math.rsqrt %77 : vector<8x1xf32>
    %79 = arith.mulf %75, %78 : vector<8x1xf32>
    %80 = vector.broadcast %79 : vector<8x1xf32> to vector<8x60xf32>
    %81 = arith.mulf %69, %80 : vector<8x60xf32>
    %82 = vector.extract_strided_slice %6 {offsets = [0, 2], sizes = [8, 1], strides = [1, 1]} : vector<8x3xf32> to vector<8x1xf32>
    %83 = vector.broadcast %82 : vector<8x1xf32> to vector<8x60xf32>
    %84 = arith.addf %81, %83 : vector<8x60xf32>
    %85 = vector.extract_strided_slice %84 {offsets = [0, 0], sizes = [8, 54], strides = [1, 1]} : vector<8x60xf32> to vector<8x54xf32>
    %86 = vector.extract_strided_slice %84 {offsets = [0, 1], sizes = [8, 54], strides = [1, 1]} : vector<8x60xf32> to vector<8x54xf32>
    %87 = vector.extract_strided_slice %84 {offsets = [0, 2], sizes = [8, 54], strides = [1, 1]} : vector<8x60xf32> to vector<8x54xf32>
    %88 = vector.extract_strided_slice %84 {offsets = [0, 3], sizes = [8, 54], strides = [1, 1]} : vector<8x60xf32> to vector<8x54xf32>
    %89 = vector.extract_strided_slice %84 {offsets = [0, 4], sizes = [8, 54], strides = [1, 1]} : vector<8x60xf32> to vector<8x54xf32>
    %90 = vector.extract_strided_slice %84 {offsets = [0, 5], sizes = [8, 54], strides = [1, 1]} : vector<8x60xf32> to vector<8x54xf32>
    %91 = vector.extract_strided_slice %84 {offsets = [0, 6], sizes = [8, 54], strides = [1, 1]} : vector<8x60xf32> to vector<8x54xf32>
    %92 = tpu.concatenate %85, %86, %87, %88, %89, %90, %91 in 0 : vector<8x54xf32>, vector<8x54xf32>, vector<8x54xf32>, vector<8x54xf32>, vector<8x54xf32>, vector<8x54xf32>, vector<8x54xf32> -> vector<56x54xf32>
    %cst_16 = arith.constant dense<0.000000e+00> : vector<4x54xf32>
    %93 = tpu.matmul %9, %92, %cst_16 {dimension_numbers = #tpu.dot_dimension_numbers<[1], [0], [0], [1], [0, 0, 1, 1], [], []>} : vector<4x56xf32>, vector<56x54xf32>, vector<4x54xf32> -> vector<4x54xf32>
    %cst_17 = arith.constant dense<0.000000e+00> : vector<4x16xf32>
    %94 = tpu.matmul %93, %3, %cst_17 {dimension_numbers = #tpu.dot_dimension_numbers<[1], [0], [0], [1], [0, 0, 1, 1], [], []>} : vector<4x54xf32>, vector<54x16xf32>, vector<4x16xf32> -> vector<4x16xf32>
    %95 = vector.extract_strided_slice %7 {offsets = [0, 0], sizes = [4, 1], strides = [1, 1]} : vector<4x3xf32> to vector<4x1xf32>
    %96 = vector.broadcast %95 : vector<4x1xf32> to vector<4x16xf32>
    %97 = arith.addf %94, %96 : vector<4x16xf32>
    %cst_18 = arith.constant 0.000000e+00 : f32
    %98 = vector.broadcast %cst_18 : f32 to vector<4x16xf32>
    %99 = arith.cmpf oge, %97, %98 : vector<4x16xf32>
    %cst_19 = arith.constant 0.00999999977 : f32
    %100 = vector.broadcast %cst_19 : f32 to vector<4x16xf32>
    %101 = arith.mulf %100, %97 : vector<4x16xf32>
    %102 = arith.select %99, %97, %101 : vector<4x16xi1>, vector<4x16xf32>
    %cst_20 = arith.constant dense<0.000000e+00> : vector<4xf32>
    %103 = vector.multi_reduction <add>, %102, %cst_20 [1] : vector<4x16xf32> to vector<4xf32>
    %104 = vector.shape_cast %103 : vector<4xf32> to vector<4x1xf32>
    %cst_21 = arith.constant 6.250000e-02 : f32
    %105 = vector.broadcast %cst_21 : f32 to vector<4x1xf32>
    %106 = arith.mulf %104, %105 : vector<4x1xf32>
    %107 = vector.broadcast %106 : vector<4x1xf32> to vector<4x16xf32>
    %108 = arith.subf %102, %107 : vector<4x16xf32>
    %109 = arith.mulf %108, %108 : vector<4x16xf32>
    %cst_22 = arith.constant dense<0.000000e+00> : vector<4xf32>
    %110 = vector.multi_reduction <add>, %109, %cst_22 [1] : vector<4x16xf32> to vector<4xf32>
    %111 = vector.shape_cast %110 : vector<4xf32> to vector<4x1xf32>
    %cst_23 = arith.constant 6.250000e-02 : f32
    %112 = vector.broadcast %cst_23 : f32 to vector<4x1xf32>
    %113 = arith.mulf %111, %112 : vector<4x1xf32>
    %114 = vector.extract_strided_slice %7 {offsets = [0, 1], sizes = [4, 1], strides = [1, 1]} : vector<4x3xf32> to vector<4x1xf32>
    %cst_24 = arith.constant 9.99999974E-6 : f32
    %115 = vector.broadcast %cst_24 : f32 to vector<4x1xf32>
    %116 = arith.addf %113, %115 : vector<4x1xf32>
    %117 = math.rsqrt %116 : vector<4x1xf32>
    %118 = arith.mulf %114, %117 : vector<4x1xf32>
    %119 = vector.broadcast %118 : vector<4x1xf32> to vector<4x16xf32>
    %120 = arith.mulf %108, %119 : vector<4x16xf32>
    %121 = vector.extract_strided_slice %7 {offsets = [0, 2], sizes = [4, 1], strides = [1, 1]} : vector<4x3xf32> to vector<4x1xf32>
    %122 = vector.broadcast %121 : vector<4x1xf32> to vector<4x16xf32>
    %123 = arith.addf %120, %122 : vector<4x16xf32>
    %124 = vector.extract_strided_slice %123 {offsets = [0, 0], sizes = [4, 12], strides = [1, 1]} : vector<4x16xf32> to vector<4x12xf32>
    %125 = vector.extract_strided_slice %123 {offsets = [0, 1], sizes = [4, 12], strides = [1, 1]} : vector<4x16xf32> to vector<4x12xf32>
    %126 = vector.extract_strided_slice %123 {offsets = [0, 2], sizes = [4, 12], strides = [1, 1]} : vector<4x16xf32> to vector<4x12xf32>
    %127 = vector.extract_strided_slice %123 {offsets = [0, 3], sizes = [4, 12], strides = [1, 1]} : vector<4x16xf32> to vector<4x12xf32>
    %128 = vector.extract_strided_slice %123 {offsets = [0, 4], sizes = [4, 12], strides = [1, 1]} : vector<4x16xf32> to vector<4x12xf32>
    %129 = tpu.concatenate %124, %125, %126, %127, %128 in 0 : vector<4x12xf32>, vector<4x12xf32>, vector<4x12xf32>, vector<4x12xf32>, vector<4x12xf32> -> vector<20x12xf32>
    %cst_25 = arith.constant dense<0.000000e+00> : vector<2x12xf32>
    %130 = tpu.matmul %10, %129, %cst_25 {dimension_numbers = #tpu.dot_dimension_numbers<[1], [0], [0], [1], [0, 0, 1, 1], [], []>} : vector<2x20xf32>, vector<20x12xf32>, vector<2x12xf32> -> vector<2x12xf32>
    %cst_26 = arith.constant dense<0.000000e+00> : vector<2x4xf32>
    %131 = tpu.matmul %130, %4, %cst_26 {dimension_numbers = #tpu.dot_dimension_numbers<[1], [0], [0], [1], [0, 0, 1, 1], [], []>} : vector<2x12xf32>, vector<12x4xf32>, vector<2x4xf32> -> vector<2x4xf32>
    %132 = vector.extract_strided_slice %8 {offsets = [0, 0], sizes = [2, 1], strides = [1, 1]} : vector<2x3xf32> to vector<2x1xf32>
    %133 = vector.broadcast %132 : vector<2x1xf32> to vector<2x4xf32>
    %134 = arith.addf %131, %133 : vector<2x4xf32>
    %cst_27 = arith.constant 0.000000e+00 : f32
    %135 = vector.broadcast %cst_27 : f32 to vector<2x4xf32>
    %136 = arith.cmpf oge, %134, %135 : vector<2x4xf32>
    %cst_28 = arith.constant 0.00999999977 : f32
    %137 = vector.broadcast %cst_28 : f32 to vector<2x4xf32>
    %138 = arith.mulf %137, %134 : vector<2x4xf32>
    %139 = arith.select %136, %134, %138 : vector<2x4xi1>, vector<2x4xf32>
    %cst_29 = arith.constant dense<0.000000e+00> : vector<2xf32>
    %140 = vector.multi_reduction <add>, %139, %cst_29 [1] : vector<2x4xf32> to vector<2xf32>
    %141 = vector.shape_cast %140 : vector<2xf32> to vector<2x1xf32>
    %cst_30 = arith.constant 2.500000e-01 : f32
    %142 = vector.broadcast %cst_30 : f32 to vector<2x1xf32>
    %143 = arith.mulf %141, %142 : vector<2x1xf32>
    %144 = vector.broadcast %143 : vector<2x1xf32> to vector<2x4xf32>
    %145 = arith.subf %139, %144 : vector<2x4xf32>
    %146 = arith.mulf %145, %145 : vector<2x4xf32>
    %cst_31 = arith.constant dense<0.000000e+00> : vector<2xf32>
    %147 = vector.multi_reduction <add>, %146, %cst_31 [1] : vector<2x4xf32> to vector<2xf32>
    %148 = vector.shape_cast %147 : vector<2xf32> to vector<2x1xf32>
    %cst_32 = arith.constant 2.500000e-01 : f32
    %149 = vector.broadcast %cst_32 : f32 to vector<2x1xf32>
    %150 = arith.mulf %148, %149 : vector<2x1xf32>
    %151 = vector.extract_strided_slice %8 {offsets = [0, 1], sizes = [2, 1], strides = [1, 1]} : vector<2x3xf32> to vector<2x1xf32>
    %cst_33 = arith.constant 9.99999974E-6 : f32
    %152 = vector.broadcast %cst_33 : f32 to vector<2x1xf32>
    %153 = arith.addf %150, %152 : vector<2x1xf32>
    %154 = math.rsqrt %153 : vector<2x1xf32>
    %155 = arith.mulf %151, %154 : vector<2x1xf32>
    %156 = vector.broadcast %155 : vector<2x1xf32> to vector<2x4xf32>
    %157 = arith.mulf %145, %156 : vector<2x4xf32>
    %158 = vector.extract_strided_slice %8 {offsets = [0, 2], sizes = [2, 1], strides = [1, 1]} : vector<2x3xf32> to vector<2x1xf32>
    %159 = vector.broadcast %158 : vector<2x1xf32> to vector<2x4xf32>
    %160 = arith.addf %157, %159 : vector<2x4xf32>
    %c0_34 = arith.constant 0 : index
    %c0_35 = arith.constant 0 : index
    %161 = vector.load %arg5[%c0_34, %c0_35] : memref<2x4xf32, #tpu.memory_space<vmem>>, vector<2x4xf32>
    tpu.vector_store %arg5[%c0_34, %c0_35], %160 {strides = array<i32>} : memref<2x4xf32, #tpu.memory_space<vmem>>, vector<2x4xf32>,
    return
  }
}

</mosaic_0001>

<bundles_post_ra>
// kernel: encoder_forward.1
= control target key start
LH: loop header
LB: loop body
LE: loop exit
PB: predicated region body
PF: predicated region fallthrough
CT: control target
= control target key end

     0   :  { %v937_v0 = vmov 1   ;;  %v938_v2 = vmov 3   ;;  %v939_v3 = vmov 2   ;;  %v940_v4 = vmov 4   ;;  %s947_s16 = smov 127   ;;  %s949_s24 = smov 125   ;;  %s1235_s1 = inlined_call_operand.vmem [shape: f32[8,128], index: 1, kind: input, shape index: {}]   ;;  %s1236_s2 = inlined_call_operand.vmem [shape: f32[248,60], index: 2, kind: input, shape index: {}]   ;;  %s1237_s0 = inlined_call_operand.vmem [shape: f32[8,256], index: 0, kind: input, shape index: {}]   ;;  %s1238_s3 = inlined_call_operand.vmem [shape: f32[54,16], index: 3, kind: input, shape index: {}]   ;;  %s1239_s4 = inlined_call_operand.vmem [shape: f32[12,4], index: 4, kind: input, shape index: {}]   ;;  %s1240_s5 = inlined_call_operand.vmem [shape: f32[2,4], index: 5, kind: output, shape index: {}]  }
   0x1   :  { %913 = vset.pattern.permute.xlu0 %v937_v0  ;;  %v1002_v1 = vld [vmem:[%s1235_s1] sm:$0xff]  ;;  %915 = vset.pattern.permute.xlu1 %v938_v2  ;;  %v941_v5 = vmov 5   ;;  %v942_v6 = vmov 6   ;;  %v943_v7 = vmov 7   ;;  %v944_v8 = vmov 0   ;;  %v24_v12 = vld [vmem:[%s1236_s2 + $0x8] sm:$0xff] }
   0x2   :  { %71 = vperm.xlu0 %913, %v1002_v1   ;;  %107 = vperm.xlu1 %915, %v1002_v1   ;;  %v945_v9 = vmov 8   ;;  %v946_v10 = vmov 0.0|0.0   ;;  %v23_v11 = vld [vmem:[%s1236_s2] sm:$0xff]  ;;  %v25_v13 = vld [vmem:[%s1236_s2 + $0x10] sm:$0xff]  ;;  %v26_v15 = vld [vmem:[%s1236_s2 + $0x18] sm:$0xff]  ;;  %s950_s29 = smov 124  }
   0x3   :  { %811 = vmatprep.subr.bf16.mxu0 %v946_v10  ;;  %856 = vmatprep.subr.bf16.mxu1 %v946_v10  ;;  %v812_v14 = vpack.c.bf16 %v24_v12, %v23_v11  ;;  %v815_v16 = vpack.c.bf16 %v26_v15, %v25_v13  ;;  %v27_v17 = vld [vmem:[%s1236_s2 + $0x20] sm:$0xff]  ;;  %v28_v18 = vld [vmem:[%s1236_s2 + $0x28] sm:$0xff]  ;;  %v29_v20 = vld [vmem:[%s1236_s2 + $0x30] sm:$0xff]  ;;  %s951_s9 = smov 123   ;;  %s953_s12 = smov 122   ;;  %vm82_vm0 = vcmask 1039360  }
   0x4   :  { %v818_v19 = vpack.c.bf16 %v28_v18, %v27_v17  ;;  %v30_v21 = vld [vmem:[%s1236_s2 + $0x38] sm:$0xff]  ;;  %v31_v23 = vld [vmem:[%s1236_s2 + $0x40] sm:$0xff]  ;;  %v32_v24 = vld [vmem:[%s1236_s2 + $0x48] sm:$0xff]  ;;  %s955_s13 = smov 121   ;;  %vm100_vm1 = vcmask 1031168   ;;  %vm118_vm2 = vcmask 1022976  }
   0x5   :  { %813 = vmatpush1.bf16.msra.mxu0 %v812_v14  ;;  %v821_v22 = vpack.c.bf16 %v30_v21, %v29_v20  ;;  %v824_v25 = vpack.c.bf16 %v32_v24, %v31_v23  ;;  %v33_v26 = vld [vmem:[%s1236_s2 + $0x50] sm:$0xff]  ;;  %v34_v27 = vld [vmem:[%s1236_s2 + $0x58] sm:$0xff]  ;;  %v35_v29 = vld [vmem:[%s1236_s2 + $0x60] sm:$0xff]  ;;  %v952_v14 = vmov 0.0   ;;  %vm136_vm3 = vcmask 1014784   ;;  %s960_s14 = smov 110  }
   0x6   :  { %914 = vset.pattern.permute.xlu0 %v939_v3  ;;  %916 = vset.pattern.permute.xlu1 %v940_v4  ;;  %v827_v28 = vpack.c.bf16 %v34_v27, %v33_v26  ;;  %v36_v30 = vld [vmem:[%s1236_s2 + $0x68] sm:$0xff]  ;;  %v37_v32 = vld [vmem:[%s1236_s2 + $0x70] sm:$0xff]  ;;  %v38_v33 = vld [vmem:[%s1236_s2 + $0x78] sm:$0xff]  ;;  %vm154_vm4 = vcmask 1006592   ;;  %vm172_vm5 = vcmask 998400   ;;  %vm190_vm6 = vcmask 990208  }
   0x7   :  { %89 = vperm.xlu0 %914, %v1002_v1   ;;  %125 = vperm.xlu1 %916, %v1002_v1   ;;  %v830_v31 = vpack.c.bf16 %v36_v30, %v35_v29  ;;  %v833_v34 = vpack.c.bf16 %v38_v33, %v37_v32  ;;  %v39_v35 = vld [vmem:[%s1236_s2 + $0x80] sm:$0xff]  ;;  %v40_v36 = vld [vmem:[%s1236_s2 + $0x88] sm:$0xff]  ;;  %v41_v38 = vld [vmem:[%s1236_s2 + $0x90] sm:$0xff]  ;;  %vm208_vm7 = vcmask 982016   ;;  %vm294_vm9 = vcmask 490496  }
   0x8   :  { %814 = vmatprep.subr.bf16.mxu0 %v946_v10  ;;  %v836_v37 = vpack.c.bf16 %v40_v36, %v39_v35  ;;  %v42_v39 = vld [vmem:[%s1236_s2 + $0x98] sm:$0xff]  ;;  %v1087_v40 = vld [vmem:[%s1237_s0] sm:$0xff]  ;;  %v44_v46 = vld [vmem:[%s1236_s2 + $0xa8] sm:$0xff]  ;;  %vm959_vm10 = vmmov 0   ;;  %vm340_vm11 = vcmask 457728   ;;  %vm421_vm12 = vcmask 1045504  }
   0x9   :  { %816 = vmatpush1.bf16.msra.mxu0 %v815_v16  ;;  %v839_v41 = vpack.c.bf16 %v42_v39, %v41_v38  ;;  %v43_v45 = vld [vmem:[%s1236_s2 + $0xa0] sm:$0xff]  ;;  %v1100_v47 = vld [vmem:[%s1237_s0 + $0x8] sm:$0xff]  ;;  %v45_v51 = vld [vmem:[%s1236_s2 + $0xb0] sm:$0xff]  ;;  %s948_s0 = smov 126   ;;  %775 = vmatprep.mubr.msk.f32.mxu1 %vm959_vm10, %v952_v14  ;;  %vm417_vm13 = vcmask 441344   ;;  %vm498_vm15 = vcmask 125952  }
   0xa   :  { %817 = vmatprep.subr.bf16.mxu0 %v946_v10  ;;  %v842_v48 = vpack.c.bf16 %v44_v46, %v43_v45  ;;  %v46_v52 = vld [vmem:[%s1236_s2 + $0xb8] sm:$0xff]  ;;  %v47_v58 = vld [vmem:[%s1236_s2 + $0xc0] sm:$0xff]  ;;  %v48_v59 = vld [vmem:[%s1236_s2 + $0xc8] sm:$0xff] }
   0xb   :  { %917 = vset.pattern.permute.xlu1 %v941_v5  ;;  %918 = vset.pattern.permute.xlu0 %v942_v6  ;;  %v845_v56 = vpack.c.bf16 %v46_v52, %v45_v51  ;;  %v848_v60 = vpack.c.bf16 %v48_v59, %v47_v58  ;;  %v49_v0 = vld [vmem:[%s1236_s2 + $0xd0] sm:$0xff]  ;;  %v50_v2 = vld [vmem:[%s1236_s2 + $0xd8] sm:$0xff] }
   0xc   :  { %143 = vperm.xlu1 %917, %v1002_v1   ;;  %161 = vperm.xlu0 %918, %v1002_v1   ;;  %v851_v3 = vpack.c.bf16 %v50_v2, %v49_v0  ;;  %v53_v15 = vld [vmem:[%s1236_s2 + $0xf0] sm:$0xff] }
   0xd   :  { %819 = vmatpush1.bf16.msra.mxu0 %v818_v19  ;;  %v954_v19 = vmov 9  }
   0xe   :  { %820 = vmatprep.subr.bf16.mxu0 %v946_v10 }
  0x10   :  { %919 = vset.pattern.permute.xlu1 %v943_v7  ;;  %921 = vset.pattern.permute.xlu0 %v944_v8  ;;  %v51_v7 = vld [vmem:[%s1236_s2 + $0xe0] sm:$0xff]  ;;  %v52_v8 = vld [vmem:[%s1236_s2 + $0xe8] sm:$0xff]  ;;  %s956_s2 = smov 120  }
  0x11   :  { %179 = vperm.xlu1 %919, %v1002_v1   ;;  %65 = vperm.xlu0 %921, %v1002_v1  }
  0x12   :  { %822 = vmatpush1.bf16.msra.mxu0 %v821_v22 }
  0x13   :  { %823 = vmatprep.subr.bf16.mxu0 %v946_v10 }
  0x15   :  { %920 = vset.pattern.permute.xlu1 %v945_v9  ;;  %v854_v9 = vpack.c.bf16 %v52_v8, %v51_v7  ;;  %922 = vset.pattern.permute.xlu0 %v954_v19 }
  0x16   :  { %197 = vperm.xlu1 %920, %v1002_v1   ;;  %825 = vmatpush1.bf16.msra.mxu0 %v824_v25 }
  0x17   :  { %826 = vmatprep.subr.bf16.mxu0 %v946_v10 }
  0x1a   :  { %828 = vmatpush1.bf16.msra.mxu0 %v827_v28 }
  0x1b   :  { %829 = vmatprep.subr.bf16.mxu0 %v946_v10 }
  0x1e   :  { %831 = vmatpush1.bf16.msra.mxu0 %v830_v31 }
  0x1f   :  { %832 = vmatprep.subr.bf16.mxu0 %v946_v10 }
  0x22   :  { %834 = vmatpush1.bf16.msra.mxu0 %v833_v34 }
  0x23   :  { %835 = vmatprep.subr.bf16.mxu0 %v946_v10 }
  0x26   :  { %837 = vmatpush1.bf16.msra.mxu0 %v836_v37 }
  0x27   :  { %838 = vmatprep.subr.bf16.mxu0 %v946_v10 }
  0x2a   :  { %840 = vmatpush1.bf16.msra.mxu0 %v839_v41 }
  0x2b   :  { %841 = vmatprep.subr.bf16.mxu0 %v946_v10 }
  0x2e   :  { %843 = vmatpush1.bf16.msra.mxu0 %v842_v48 }
  0x2f   :  { %844 = vmatprep.subr.bf16.mxu0 %v946_v10 }
  0x32   :  { %846 = vmatpush1.bf16.msra.mxu0 %v845_v56 }
  0x33   :  { %847 = vmatprep.subr.bf16.mxu0 %v946_v10 }
  0x36   :  { %849 = vmatpush1.bf16.msra.mxu0 %v848_v60 }
  0x37   :  { %850 = vmatprep.subr.bf16.mxu0 %v946_v10 }
  0x3a   :  { %852 = vmatpush1.bf16.msra.mxu0 %v851_v3 }
  0x3b   :  { %853 = vmatprep.subr.bf16.mxu0 %v946_v10 }
  0x3e   :  { %855 = vmatpush1.bf16.msra.mxu0 %v854_v9 }
  0x3f   :  { %281 = vmatprep.subr.mxu0 %v952_v14 }
  0x42   :  { %282 = vmatpush1.msra.mxu0 %v53_v15 }
  0x81   :  { %v72_v42 = vpop.permute.xlu0 %71  ;;  %v108_v44 = vpop.permute.xlu1 %107 }
  0x82   :  { %v74_v43 = vmul.f32 %v72_v42, %v1087_v40  ;;  %v75_v49 = vmul.f32 %v72_v42, %v1100_v47  ;;  %v110_v57 = vmul.f32 %v108_v44, %v1087_v40  ;;  %v111_v62 = vmul.f32 %v108_v44, %v1100_v47 }
  0x84   :  { %78 = vrot.lane.b32.xlu1 %v74_v43, %s947_s16 }
  0x86   :  { %v90_v50 = vpop.permute.xlu0 %89  ;;  %v126_v55 = vpop.permute.xlu1 %125 }
  0x87   :  { %v92_v53 = vmul.f32 %v90_v50, %v1087_v40  ;;  %v93_v54 = vmul.f32 %v90_v50, %v1100_v47  ;;  %v128_v61 = vmul.f32 %v126_v55, %v1087_v40  ;;  %v129_v4 = vmul.f32 %v126_v55, %v1100_v47 }
  0x88   :  { %80 = vrot.lane.b32.xlu1 %v75_v49, %s947_s16 }
  0x89   :  { %96 = vrot.lane.b32.xlu0 %v92_v53, %s948_s0 }
  0x8b   :  { %v144_v63 = vpop.permute.xlu1 %143  ;;  %v162_v6 = vpop.permute.xlu0 %161 }
  0x8c   :  { %98 = vrot.lane.b32.xlu1 %v93_v54, %s948_s0  ;;  %v146_v5 = vmul.f32 %v144_v63, %v1087_v40  ;;  %v147_v11 = vmul.f32 %v144_v63, %v1100_v47  ;;  %v164_v13 = vmul.f32 %v162_v6, %v1087_v40  ;;  %v165_v16 = vmul.f32 %v162_v6, %v1100_v47 }
  0x8d   :  { %114 = vrot.lane.b32.xlu0 %v110_v57, %s949_s24 }
  0x90   :  { %116 = vrot.lane.b32.xlu1 %v111_v62, %s949_s24  ;;  %v180_v12 = vpop.permute.xlu1 %179  ;;  %v66_v23 = vpop.permute.xlu0 %65 }
  0x91   :  { %132 = vrot.lane.b32.xlu0 %v128_v61, %s950_s29  ;;  %v182_v17 = vmul.f32 %v180_v12, %v1087_v40  ;;  %v183_v20 = vmul.f32 %v180_v12, %v1100_v47  ;;  %v69_v31 = vmul.f32 %v66_v23, %v1100_v47  ;;  %v68_v32 = vmul.f32 %v66_v23, %v1087_v40 }
  0x94   :  { %134 = vrot.lane.b32.xlu1 %v129_v4, %s950_s29 }
  0x95   :  { %150 = vrot.lane.b32.xlu0 %v146_v5, %s951_s9  ;;  %v198_v18 = vpop.permute.xlu1 %197 }
  0x96   :  { %v200_v21 = vmul.f32 %v198_v18, %v1087_v40  ;;  %v201_v22 = vmul.f32 %v198_v18, %v1100_v47  ;;  %v958_v18 = vmov 11  }
  0x98   :  { %152 = vrot.lane.b32.xlu1 %v147_v11, %s951_s9 }
  0x99   :  { %168 = vrot.lane.b32.xlu0 %v164_v13, %s953_s12 }
  0x9c   :  { %170 = vrot.lane.b32.xlu1 %v165_v16, %s953_s12 }
  0x9d   :  { %186 = vrot.lane.b32.xlu0 %v182_v17, %s955_s13  ;;  %v957_v17 = vmov 10  }
  0x9e   :  { %923 = vset.pattern.permute.xlu1 %v957_v17 }
  0xa0   :  { %188 = vrot.lane.b32.xlu1 %v183_v20, %s955_s13 }
  0xa1   :  { %204 = vrot.lane.b32.xlu0 %v200_v21, %s956_s2 }
  0xa4   :  { %206 = vrot.lane.b32.xlu1 %v201_v22, %s956_s2 }
  0xa5   :  { %215 = vperm.xlu0 %922, %v1002_v1  }
  0xa9   :  { %924 = vset.pattern.permute.xlu0 %v958_v18 }
  0xf6   :  { %v79_v24 = vpop.permute.xlu1 %78 }
  0xfa   :  { %v81_v25 = vpop.permute.xlu1 %80 }
  0xfb   :  { %v97_v26 = vpop.permute.xlu0 %96  ;;  %v83_v34 = vsel %vm82_vm0, %v79_v24, %v81_v25  ;;  %v87_v36 = vadd.f32 %v81_v25, %v69_v31  ;;  %vm536_vm0 = vcmask 1043456  }
  0xfc   :  { %v86_v38 = vadd.f32 %v83_v34, %v68_v32 }
  0xfe   :  { %v99_v27 = vpop.permute.xlu1 %98 }
  0xff   :  { %v115_v28 = vpop.permute.xlu0 %114  ;;  %v101_v37 = vsel %vm100_vm1, %v97_v26, %v99_v27  ;;  %v105_v41 = vadd.f32 %v99_v27, %v87_v36  ;;  %v54_v36 = vld [vmem:[%s1238_s3] sm:$0xff]  ;;  %vm541_vm1 = vcmask 162816  }
 0x100   :  { %v104_v44 = vadd.f32 %v101_v37, %v86_v38  ;;  %v55_v37 = vld [vmem:[%s1238_s3 + $0x8] sm:$0xff] }
 0x102   :  { %v117_v29 = vpop.permute.xlu1 %116 }
 0x103   :  { %v133_v30 = vpop.permute.xlu0 %132  ;;  %v119_v42 = vsel %vm118_vm2, %v115_v28, %v117_v29  ;;  %v123_v45 = vadd.f32 %v117_v29, %v105_v41  ;;  %v56_v41 = vld [vmem:[%s1238_s3 + $0x10] sm:$0xff]  ;;  %vm965_vm2 = vmmov 1  }
 0x104   :  { %v122_v47 = vadd.f32 %v119_v42, %v104_v44  ;;  %v57_v42 = vld [vmem:[%s1238_s3 + $0x18] sm:$0xff] }
 0x105   :  { %v869_v44 = vpack.c.bf16 %v57_v42, %v56_v41 }
 0x106   :  { %v135_v33 = vpop.permute.xlu1 %134 }
 0x107   :  { %v151_v35 = vpop.permute.xlu0 %150  ;;  %v137_v46 = vsel %vm136_vm3, %v133_v30, %v135_v33  ;;  %v141_v48 = vadd.f32 %v135_v33, %v123_v45  ;;  %v58_v45 = vld [vmem:[%s1238_s3 + $0x20] sm:$0xff]  ;;  %vm879_vm3 = vmpackc.low %vm536_vm0, %vm965_vm2 }
 0x108   :  { %v140_v51 = vadd.f32 %v137_v46, %v122_v47  ;;  %v59_v46 = vld [vmem:[%s1238_s3 + $0x28] sm:$0xff] }
 0x109   :  { %v872_v47 = vpack.c.bf16 %v59_v46, %v58_v45 }
 0x10a   :  { %v153_v39 = vpop.permute.xlu1 %152 }
 0x10b   :  { %v169_v43 = vpop.permute.xlu0 %168  ;;  %v155_v49 = vsel %vm154_vm4, %v151_v35, %v153_v39  ;;  %v159_v52 = vadd.f32 %v153_v39, %v141_v48  ;;  %v866_v39 = vpack.c.bf16 %v55_v37, %v54_v36  ;;  %v961_v48 = vmov 12  }
 0x10c   :  { %v158_v54 = vadd.f32 %v155_v49, %v140_v51  ;;  %vm620_vm4 = vcmask 97280  }
 0x10e   :  { %v171_v40 = vpop.permute.xlu1 %170 }
 0x10f   :  { %v187_v50 = vpop.permute.xlu0 %186  ;;  %v173_v53 = vsel %vm172_vm5, %v169_v43, %v171_v40  ;;  %v177_v56 = vadd.f32 %v171_v40, %v159_v52  ;;  %v60_v40 = vld [vmem:[%s1238_s3 + $0x30] sm:$0x3f]  ;;  %s964_s3 = smov 54  }
 0x110   :  { %v176_v58 = vadd.f32 %v173_v53, %v158_v54 }
 0x112   :  { %v189_v55 = vpop.permute.xlu1 %188 }
 0x113   :  { %v191_v57 = vsel %vm190_vm6, %v187_v50, %v189_v55  ;;  %v205_v59 = vpop.permute.xlu0 %204  ;;  %v195_v60 = vadd.f32 %v189_v55, %v177_v56  ;;  %vm700_vm6 = vcmask 25600  }
 0x114   :  { %v194_v61 = vadd.f32 %v191_v57, %v176_v58 }
 0x116   :  { %v207_v62 = vpop.permute.xlu1 %206 }
 0x117   :  { %v209_v63 = vsel %vm208_vm7, %v205_v59, %v207_v62  ;;  %v213_v0 = vadd.f32 %v207_v62, %v195_v60 }
 0x118   :  { %v212_v2 = vadd.f32 %v209_v63, %v194_v61  ;;  %v962_v63 = vmov 13  }
 0x119   :  { %730 = vmatprep.mubr.msk.f32.mxu0 %vm208_vm7, %v213_v0  ;;  %v963_v0 = vmov 14  }
 0x11a   :  { %286 = vmatmul.mubr.f32.vlgmr.msra.gmra.mrb[0].mxu0 %v212_v2 }
 0x124   :  { %v216_v3 = vpop.permute.xlu0 %215 }
 0x1ed   :  { %v287_v4 = vpop.f32.mrb[0].mxu0 }
 0x1ee   :  { %v288_v5 = vadd.f32 %v287_v4, %v216_v3  ;;  %v289_v6 = vpop.f32.mrb[1].mxu0 }
 0x1f0   :  { %v292_v7 = vmul.f32 0.01, %v288_v5  ;;  %vm291_vm8 = vcmp.ge.f32.partialorder %v288_v5, 0.0 }
 0x1f2   :  { %v293_v8 = vsel %vm291_vm8, %v288_v5, %v292_v7 }
 0x1f3   :  { %v295_v9 = vsel %vm294_vm9, %v293_v8, 0.0 }
 0x1f4   :  { %296 = vadd.xlane.f32.xlu1 %v295_v9 }
 0x281   :  { %v297_v11 = vpop.xlane.xlu1 %296 }
 0x282   :  { %v298_v12 = vmul.f32 0.016666668, %v297_v11 }
 0x284   :  { %v299_v13 = vsub.f32 %v293_v8, %v298_v12 }
 0x286   :  { %v300_v15 = vmul.f32 %v299_v13, %v299_v13 }
 0x288   :  { %v301_v16 = vsel %vm294_vm9, %v300_v15, 0.0 }
 0x289   :  { %302 = vadd.xlane.f32.xlu0 %v301_v16 }
 0x29f   :  { %315 = vperm.xlu0 %924, %v1002_v1  }
 0x2a3   :  { %926 = vset.pattern.permute.xlu0 %v962_v63 }
 0x316   :  { %v303_v19 = vpop.xlane.xlu0 %302 }
 0x317   :  { %v304_v20 = vmul.f32 0.016666668, %v303_v19 }
 0x319   :  { %v305_v21 = vadd.f32 1e-05, %v304_v20  ;;  %v61_v20 = vld [vmem:[%s1239_s4] sm:$0xff] }
 0x31b   :  { %931 = vrsqrt.f32 %v305_v21  ;;  %v62_v21 = vld [vmem:[%s1239_s4 + $0x8] sm:$0xf] }
 0x31e   :  { %v316_v25 = vpop.permute.xlu0 %315 }
 0x325   :  { %v932_v22 = vpop.eup %931 }
 0x326   :  { %v307_v23 = vmul.f32 %v932_v22, %v1002_v1 }
 0x328   :  { %310 = vperm.xlu1 %923, %v307_v23   ;;  %v878_v23 = vpack.c.bf16 %v62_v21, %v61_v20 }
 0x32c   :  { %925 = vset.pattern.permute.xlu1 %v961_v48 }
 0x3a7   :  { %v311_v24 = vpop.permute.xlu1 %310 }
 0x3a8   :  { %v313_v26 = vmul.f32 %v311_v24, %v299_v13 }
 0x3aa   :  { %v318_v27 = vadd.f32 %v316_v25, %v313_v26  ;;  %v966_v25 = vmov 15  }
 0x3ac   :  { %320 = vrot.lane.b32.xlu1 %v318_v27, %s947_s16 }
 0x3b0   :  { %323 = vrot.lane.b32.xlu1 %v318_v27, %s948_s0 }
 0x3b4   :  { %326 = vrot.lane.b32.xlu1 %v318_v27, %s949_s24 }
 0x3b8   :  { %329 = vrot.lane.b32.xlu1 %v318_v27, %s950_s29 }
 0x3bc   :  { %332 = vrot.lane.b32.xlu1 %v318_v27, %s951_s9 }
 0x3c0   :  { %335 = vrot.lane.b32.xlu1 %v318_v27, %s953_s12 }
 0x3c4   :  { %338 = vrot.lane.b32.xlu1 %v1002_v1, %s960_s14 }
 0x3c8   :  { %414 = vperm.xlu1 %925, %v1002_v1  }
 0x3cc   :  { %927 = vset.pattern.permute.xlu1 %v963_v0 }
 0x41e   :  { %v321_v28 = vpop.permute.xlu1 %320 }
 0x41f   :  { %v857_v29 = vpack.c.bf16 %v321_v28, %v318_v27 }
 0x421   :  { %858 = vmatpush3.bf16.msra.mxu1 %v857_v29 }
 0x422   :  { %v324_v30 = vpop.permute.xlu1 %323  ;;  %859 = vmatprep.subr.bf16.mxu1 %v946_v10 }
 0x426   :  { %v327_v31 = vpop.permute.xlu1 %326 }
 0x427   :  { %v860_v32 = vpack.c.bf16 %v327_v31, %v324_v30 }
 0x429   :  { %861 = vmatpush3.bf16.msra.mxu1 %v860_v32 }
 0x42a   :  { %v330_v33 = vpop.permute.xlu1 %329  ;;  %862 = vmatprep.subr.bf16.mxu1 %v946_v10 }
 0x42e   :  { %v333_v34 = vpop.permute.xlu1 %332 }
 0x42f   :  { %v863_v35 = vpack.c.bf16 %v333_v34, %v330_v33 }
 0x431   :  { %864 = vmatpush3.bf16.msra.mxu1 %v863_v35 }
 0x432   :  { %v336_v38 = vpop.permute.xlu1 %335  ;;  %773 = vmatprep.subr.mxu1 %v952_v14 }
 0x435   :  { %774 = vmatpush3.msra.mxu1 %v336_v38  ;;  %v967_v38 = vmov 16  }
 0x436   :  { %v339_v43 = vpop.permute.xlu1 %338  ;;  %865 = vmatprep.subr.bf16.mxu1 %v946_v10 }
 0x437   :  { %776 = vmatmul.mubr.msk.f32.vlgmr.msra.gmra.mrb[0].mxu1 %vm340_vm11, %v339_v43 }
 0x438   :  { %867 = vmatpush3.bf16.msra.mxu1 %v866_v39  ;;  %792 = vmatprep.mubr.msk.f32.mxu1 %vm959_vm10, %v952_v14  ;;  %v968_v39 = vmov 17  }
 0x439   :  { %868 = vmatprep.subr.bf16.mxu1 %v946_v10 }
 0x43c   :  { %870 = vmatpush3.bf16.msra.mxu1 %v869_v44 }
 0x43d   :  { %871 = vmatprep.subr.bf16.mxu1 %v946_v10 }
 0x440   :  { %873 = vmatpush3.bf16.msra.mxu1 %v872_v47 }
 0x441   :  { %790 = vmatprep.subr.mxu1 %v952_v14 }
 0x444   :  { %791 = vmatpush3.msk.msra.mxu1 %vm421_vm12, %v60_v40 }
 0x445   :  { %874 = vmatprep.subr.bf16.mxu1 %v946_v10 }
 0x447   :  { %v415_v51 = vpop.permute.xlu1 %414 }
 0x50a   :  { %v409_v49 = vpop.f32.mrb[0].mxu1 }
 0x50b   :  { %v777_v50 = vpop.f32.mrb[1].mxu1  ;;  %793 = vmatmul.mubr.msk.f32.vlgmr.msra.gmra.mrb[2].mxu1 %vm417_vm13, %v409_v49 }
 0x50c   :  { %801 = vmatprep.mubr.msk.f32.mxu1 %vm959_vm10, %v952_v14 }
 0x5de   :  { %v491_v52 = vpop.f32.mrb[2].mxu1 }
 0x5df   :  { %v492_v53 = vadd.f32 %v491_v52, %v415_v51  ;;  %v794_v54 = vpop.f32.mrb[3].mxu1 }
 0x5e1   :  { %v496_v55 = vmul.f32 0.01, %v492_v53  ;;  %vm495_vm14 = vcmp.ge.f32.partialorder %v492_v53, 0.0 }
 0x5e3   :  { %v497_v56 = vsel %vm495_vm14, %v492_v53, %v496_v55 }
 0x5e4   :  { %v499_v57 = vsel %vm498_vm15, %v497_v56, 0.0 }
 0x5e5   :  { %500 = vadd.xlane.f32.xlu0 %v499_v57 }
 0x672   :  { %v501_v58 = vpop.xlane.xlu0 %500 }
 0x673   :  { %v502_v59 = vmul.f32 0.0625, %v501_v58 }
 0x675   :  { %v503_v60 = vsub.f32 %v497_v56, %v502_v59 }
 0x677   :  { %v504_v61 = vmul.f32 %v503_v60, %v503_v60 }
 0x679   :  { %v505_v62 = vsel %vm498_vm15, %v504_v61, 0.0 }
 0x67a   :  { %506 = vadd.xlane.f32.xlu1 %v505_v62 }
 0x68b   :  { %519 = vperm.xlu1 %927, %v1002_v1  }
 0x68f   :  { %929 = vset.pattern.permute.xlu1 %v967_v38 }
 0x707   :  { %v507_v2 = vpop.xlane.xlu1 %506 }
 0x708   :  { %v508_v3 = vmul.f32 0.0625, %v507_v2 }
 0x70a   :  { %v509_v4 = vadd.f32 1e-05, %v508_v3 }
 0x70b   :  { %v520_v8 = vpop.permute.xlu1 %519 }
 0x70c   :  { %933 = vrsqrt.f32 %v509_v4 }
 0x716   :  { %v934_v5 = vpop.eup %933 }
 0x717   :  { %v511_v6 = vmul.f32 %v934_v5, %v1002_v1 }
 0x719   :  { %514 = vperm.xlu0 %926, %v511_v6  }
 0x71d   :  { %928 = vset.pattern.permute.xlu0 %v966_v25 }
 0x71e   :  { %617 = vperm.xlu0 %928, %v1002_v1  }
 0x722   :  { %930 = vset.pattern.permute.xlu0 %v968_v39 }
 0x798   :  { %v515_v7 = vpop.permute.xlu0 %514 }
 0x799   :  { %v517_v9 = vmul.f32 %v515_v7, %v503_v60 }
 0x79b   :  { %v522_v11 = vadd.f32 %v520_v8, %v517_v9 }
 0x79d   :  { %528 = vrot.lane.b32.xlu1 %v522_v11, %s948_s0  ;;  %v524_v12 = vrot.slane %v522_v11, 4  ;;  %v618_v28 = vpop.permute.xlu0 %617 }
 0x7a1   :  { %525 = vrot.lane.b32.xlu1 %v524_v12, %s947_s16 }
 0x7a5   :  { %531 = vrot.lane.b32.xlu1 %v524_v12, %s949_s24 }
 0x7a9   :  { %534 = vrot.lane.b32.xlu1 %v522_v11, %s950_s29 }
 0x7ad   :  { %539 = vrot.lane.b32.xlu1 %v1002_v1, %s964_s3 }
 0x80f   :  { %v529_v13 = vpop.permute.xlu1 %528 }
 0x813   :  { %v526_v15 = vpop.permute.xlu1 %525 }
 0x814   :  { %v537_v17 = vsel %vm536_vm0, %v522_v11, %v526_v15 }
 0x817   :  { %v532_v16 = vpop.permute.xlu1 %531 }
 0x818   :  { %v538_v18 = vsel %vm536_vm0, %v529_v13, %v532_v16 }
 0x819   :  { %v875_v19 = vpack.c.bf16 %v538_v18, %v537_v17 }
 0x81b   :  { %876 = vmatpush3.bf16.msra.mxu1 %v875_v19  ;;  %v535_v22 = vpop.permute.xlu1 %534 }
 0x81c   :  { %799 = vmatprep.subr.mxu1 %v952_v14 }
 0x81f   :  { %800 = vmatpush3.msk.msra.mxu1 %vm536_vm0, %v535_v22  ;;  %v540_v24 = vpop.permute.xlu1 %539 }
 0x820   :  { %802 = vmatmul.mubr.msk.f32.vlgmr.msra.gmra.mrb[4].mxu1 %vm541_vm1, %v540_v24  ;;  %877 = vmatprep.subr.bf16.mxu1 %v946_v10 }
 0x821   :  { %880 = vmatpush3.bf16.msk.msra.mxu1 %vm879_vm3, %v878_v23  ;;  %808 = vmatprep.mubr.msk.f32.mxu1 %vm959_vm10, %v952_v14 }
 0x8f3   :  { %v612_v26 = vpop.f32.mrb[4].mxu1 }
 0x8f4   :  { %v803_v27 = vpop.f32.mrb[5].mxu1  ;;  %809 = vmatmul.mubr.msk.f32.vlgmr.msra.gmra.mrb[6].mxu1 %vm620_vm4, %v612_v26 }
 0x9c7   :  { %v693_v29 = vpop.f32.mrb[6].mxu1 }
 0x9c8   :  { %v694_v30 = vadd.f32 %v693_v29, %v618_v28  ;;  %v810_v31 = vpop.f32.mrb[7].mxu1 }
 0x9ca   :  { %v698_v32 = vmul.f32 0.01, %v694_v30  ;;  %vm697_vm5 = vcmp.ge.f32.partialorder %v694_v30, 0.0 }
 0x9cc   :  { %v699_v10 = vsel %vm697_vm5, %v694_v30, %v698_v32 }
 0x9cd   :  { %v701_v33 = vsel %vm700_vm6, %v699_v10, 0.0 }
 0x9ce   :  { %702 = vadd.xlane.f32.xlu1 %v701_v33 }
 0xa5b   :  { %v703_v14 = vpop.xlane.xlu1 %702 }
 0xa5c   :  { %v704_v34 = vmul.f32 0.25, %v703_v14 }
 0xa5e   :  { %v705_v35 = vsub.f32 %v699_v10, %v704_v34 }
 0xa60   :  { %v706_v36 = vmul.f32 %v705_v35, %v705_v35 }
 0xa62   :  { %v707_v37 = vsel %vm700_vm6, %v706_v36, 0.0 }
 0xa63   :  { %708 = vadd.xlane.f32.xlu0 %v707_v37 }
 0xa79   :  { %721 = vperm.xlu0 %930, %v1002_v1  }
 0xaf0   :  { %v709_v41 = vpop.xlane.xlu0 %708 }
 0xaf1   :  { %v710_v42 = vmul.f32 0.25, %v709_v41 }
 0xaf3   :  { %v711_v43 = vadd.f32 1e-05, %v710_v42 }
 0xaf5   :  { %935 = vrsqrt.f32 %v711_v43 }
 0xaf8   :  { %v722_v47 = vpop.permute.xlu0 %721 }
 0xaff   :  { %v936_v44 = vpop.eup %935 }
 0xb00   :  { %v713_v45 = vmul.f32 %v936_v44, %v1002_v1 }
 0xb02   :  { %716 = vperm.xlu1 %929, %v713_v45  }
 0xb81   :  { %v717_v46 = vpop.permute.xlu1 %716 }
 0xb82   :  { %v719_v40 = vmul.f32 %v717_v46, %v705_v35 }
 0xb84   :  { %v724_v48 = vadd.f32 %v722_v47, %v719_v40 }
 0xb86   :  { %725 = vst.msk [vmem:[%s1240_s5] sm:$0x3] %vm700_vm6, %v724_v48 }

</bundles_post_ra>
